<compile_context>
chip_gen: v7x
topology: tpu7x:2x2x1
jax: 0.10.0
libtpu: 0.0.40
codegen_flags: <defaults>
</compile_context>

<pallas_src>
import jax
import jax.numpy as jnp
from jax.experimental import pallas as pl
from jax.experimental.pallas import tpu as pltpu


def _dma_copy_kernel(x_ref, o_ref, sem):
    # Single direct HBM -> HBM DMA of the whole array.  No VMEM bounce.
    cp = pltpu.make_async_copy(x_ref, o_ref, sem)
    cp.start()
    cp.wait()


def _materialize_copy(x: jax.Array) -> jax.Array:
    """Identity copy via one HBM->HBM DMA (only used when a fresh buffer is required)."""
    itemsize = jnp.dtype(x.dtype).itemsize
    return pl.pallas_call(
        _dma_copy_kernel,
        out_shape=jax.ShapeDtypeStruct(x.shape, x.dtype),
        in_specs=[pl.BlockSpec(memory_space=pl.ANY)],
        out_specs=pl.BlockSpec(memory_space=pl.ANY),
        scratch_shapes=[pltpu.SemaphoreType.DMA],
        # Pure memory traffic: read + write of the whole array.
        cost_estimate=pl.CostEstimate(
            flops=0, transcendentals=0, bytes_accessed=2 * x.size * itemsize
        ),
    )(x)


def print_layer_forward(x: jax.Array, *, materialize: bool = False) -> jax.Array:
    """Pallas equivalent of PrintLayer.forward: print shape, return x.

    Default path launches no kernel (fastest possible identity).  Pass
    materialize=True to force a fresh output buffer via the Pallas DMA kernel.
    """
    # Reproduce the `print(x.shape)` side effect.
    # TODO(synk): under jit this prints at trace time only; use jax.debug.print
    # if strict per-call printing is required.
    print(tuple(x.shape))

    if not materialize or x.size == 0:
        # Identity: the fastest kernel is no kernel (review optimization #1).
        return x

    return _materialize_copy(x)


if __name__ == "__main__":
    key = jax.random.PRNGKey(0)
    # Small NCHW input consistent with a conv-style pipeline.
    x = jax.random.normal(key, (2, 4, 16, 16), dtype=jnp.float32)

    # Default fast path: no kernel launched, x returned unchanged.
    y_fast = print_layer_forward(x)
    assert y_fast.shape == x.shape and y_fast.dtype == x.dtype

    # Exercise the Pallas HBM->HBM DMA copy path once on TPU.
    y = print_layer_forward(x, materialize=True)
    y = jax.block_until_ready(y)

    assert y.shape == x.shape and y.dtype == x.dtype
    assert bool(jnp.array_equal(y, x))
    assert bool(jnp.array_equal(y_fast, x))
    print("KERNEL_OK")
</pallas_src>

<mosaic_0001>
module attributes {stable_mosaic.version = 11 : i64} {
  func.func @_dma_copy_kernel(%arg0: memref<2x4x16x16xf32, #tpu.memory_space<any>>, %arg1: memref<2x4x16x16xf32, #tpu.memory_space<any>>, %arg2: memref<!tpu.dma_semaphore, #tpu.memory_space<semaphore_mem>>) attributes {dimension_semantics = [], scalar_prefetch = 0 : i64, scratch_operands = 1 : i64, tpu.core_type = #tpu.core_type<tc>} {
    tpu.enqueue_dma source(%arg0 : memref<2x4x16x16xf32, #tpu.memory_space<any>>) target(%arg1 : memref<2x4x16x16xf32, #tpu.memory_space<any>>) target_semaphore(%arg2 : memref<!tpu.dma_semaphore, #tpu.memory_space<semaphore_mem>>)
    tpu.wait_dma2 semaphore(%arg2 : memref<!tpu.dma_semaphore, #tpu.memory_space<semaphore_mem>>) src(%arg0 : memref<2x4x16x16xf32, #tpu.memory_space<any>>) dst(%arg1 : memref<2x4x16x16xf32, #tpu.memory_space<any>>)
    return
  }
}

</mosaic_0001>

<bundles_post_ra>
// kernel: tpu_custom_call.1
= control target key start
LH: loop header
LB: loop body
LE: loop exit
PB: predicated region body
PF: predicated region fallthrough
CT: control target
= control target key end

     0   :  { %s36_s6 = smov [#allocation2]   ;;  %s37_s7 = smov [#allocation3]   ;;  %s55_s0 = inlined_call_operand.hbm [shape: f32[2,4,16,16], index: 0, kind: input, shape index: {}]   ;;  %s56_s1 = inlined_call_operand.hbm [shape: f32[2,4,16,16], index: 1, kind: output, shape index: {}]  }
   0x1   :  { %s38_s8 = smov 0  }
   0x2   :  { %18 = dma.general %s55_s0, 2048, %s56_s1, %s36_s6, %s37_s7, [#allocation4], %s38_s8, 0  }
   0x3   :  { %34 = dma.done.wait [#allocation2], 2048 }
   0x4   :  { %35 = vsyncadd [#allocation2], 4294965248 }
   0x5   :  { %24 = vsyncmov [#allocation2] }
   0x8   :  { %s25_s13 = vpop.sfrf %24 }
   0x9   :  { %p30_p0 = scmp.ne.s32.totalorder %s25_s13, 0 }
   0xb   :  { %29 = shalt.err (%p30_p0)  }

</bundles_post_ra>
